<compile_context>
chip_gen: v7x
topology: tpu7x:2x2x1
jax: 0.10.0
libtpu: 0.0.40
codegen_flags: <defaults>
</compile_context>

<pallas_src>
import functools

import jax
import jax.numpy as jnp
from jax.experimental import pallas as pl
from jax.experimental.pallas import tpu as pltpu


def _round_up(x, m):
    return ((x + m - 1) // m) * m


def _fused_linear_layernorm_kernel(x_ref, w_ref, b_ref, g_ref, beta_ref, o_ref,
                                   *, d_real, eps, matmul_dtype):
    # x_ref: (tm, Hp) native dtype   w_ref: (Hp, Dp) matmul_dtype
    # b/g/beta: (1, Dp) f32          o_ref: (tm, Dp) out dtype
    #
    # Cast the activation tile to the matmul dtype inside the kernel (VPU cast hides
    # under the DMA/MXU pipeline); MXU matmul accumulates in f32.
    x = x_ref[...].astype(matmul_dtype)
    y = jnp.dot(x, w_ref[...], preferred_element_type=jnp.float32)
    y = y + b_ref[...]

    # Single-pass LayerNorm statistics over the real d_model columns.
    # Padded columns of w/b are zero -> padded columns of y are exactly 0 and
    # contribute nothing to sum(y) / sum(y*y); no pad correction needed.
    inv_d = 1.0 / d_real
    row_sum = jnp.sum(y, axis=-1, keepdims=True)
    row_sumsq = jnp.sum(y * y, axis=-1, keepdims=True)
    mean = row_sum * inv_d
    var = row_sumsq * inv_d - mean * mean          # E[y^2] - mean^2 (f32 throughout)
    inv_std = jax.lax.rsqrt(var + eps)

    # (y - mean) * inv_std * gamma + beta, with the per-row scalars pre-folded into
    # cheap (tm, 1) column vectors.  gamma/beta are zero in padded columns, so padded
    # output columns stay 0 (sliced off by the wrapper when padding exists).
    shift = mean * inv_std
    normed = y * inv_std - shift
    o_ref[...] = (normed * g_ref[...] + beta_ref[...]).astype(o_ref.dtype)


def _choose_row_tile(m_rows, tm_min):
    """Row-tile size. Priorities:
       1. divide M exactly (no row padding -> no extra wrapper HBM pass)
       2. >= 4 grid steps on large problems (>= 2 per v7x TensorCore, so the
          auto-pipeline can hide per-tile DMA behind the matmul)
       3. large tiles (up to 1024 rows) to amortize the ~0.35us/step overhead and
          keep the v5e MXU pipeline full.
    """
    if m_rows <= 512:
        # Small problem: one tile; pad rows only if misaligned with the minimum tile.
        return _round_up(m_rows, tm_min)
    candidates = [c for c in (1024, 768, 512, 448, 384, 320, 256, 192, 128)
                  if tm_min <= c <= m_rows and m_rows % c == 0]
    for c in candidates:                       # largest exact divisor with >= 4 steps
        if m_rows // c >= 4:
            return c
    if candidates:                             # otherwise largest exact divisor
        return candidates[0]
    # No reasonable divisor: pad tail rows, aim for ~4 tiles of <= 512 rows.
    return min(512, max(tm_min, _round_up(pl.cdiv(m_rows, 4), tm_min)))


def _vmem_limit(est_bytes):
    """Generation-aware scoped-VMEM clamp: ~56 MiB on v7x (64 MiB physical),
    up to ~100 MiB on v5e/v6e (128 MiB physical)."""
    try:
        phys = int(pltpu.get_tpu_info().vmem_capacity_bytes)
    except Exception:          # conservative default: v7x-sized VMEM
        phys = 64 * 2 ** 20
    cap = min(phys - (8 * 2 ** 20), 100 * 2 ** 20)
    return int(min(max(2 * est_bytes, 32 * 2 ** 20), cap))


def bert_encoder1_forward(last_hidden_state, w, b, gamma, beta, *,
                          tm=None, matmul_dtype=jnp.bfloat16, out_dtype=None,
                          eps=1e-6):
    """Fused Linear + LayerNorm.  last_hidden_state: [B, S, H_bert] -> [B, S, d_model]."""
    B, S, H = last_hidden_state.shape
    Hw, D = w.shape
    assert Hw == H, "weight shape must be (bert_hidden, d_model)"
    M = B * S

    if out_dtype is None:
        out_dtype = last_hidden_state.dtype

    # bf16 minimum tile is (16, 128): enforce a 16-row floor for sub-4-byte matmul dtypes.
    tm_min = 16 if jnp.dtype(matmul_dtype).itemsize < 4 else 8
    if tm is None:
        tm = _choose_row_tile(M, tm_min)
    tm = max(tm_min, _round_up(tm, tm_min))

    grid = pl.cdiv(M, tm)
    Mp = grid * tm                 # padded row count (== M whenever tm | M)
    Hp = _round_up(H, 128)         # lane-dense contraction dim (== H if already aligned)
    Dp = _round_up(D, 128)         # lane-dense output dim (== D if already aligned)

    # Activation stays in its native dtype; the bf16 cast happens inside the kernel.
    x2d = last_hidden_state.reshape(M, H)
    if Mp != M or Hp != H:
        x2d = jnp.pad(x2d, ((0, Mp - M), (0, Hp - H)))

    w_p = w.astype(matmul_dtype)
    if Hp != H or Dp != D:
        w_p = jnp.pad(w_p, ((0, Hp - H), (0, Dp - D)))

    def _param_row(v):
        v = v.astype(jnp.float32)
        if Dp != D:
            v = jnp.pad(v, (0, Dp - D))
        return v.reshape(1, Dp)

    b_p, g_p, beta_p = _param_row(b), _param_row(gamma), _param_row(beta)

    # VMEM budget: double-buffered activation/output tiles + single-copy resident
    # weight/params, with 2x headroom for kernel intermediates (y f32 tile etc.).
    x_bytes = jnp.dtype(x2d.dtype).itemsize
    out_bytes = jnp.dtype(out_dtype).itemsize
    w_bytes = jnp.dtype(matmul_dtype).itemsize
    est = (2 * tm * Hp * x_bytes       # activation tiles (double-buffered, native dtype)
           + 2 * tm * Dp * out_bytes   # output tiles (double-buffered)
           + Hp * Dp * w_bytes         # resident weight (single copy, not pipelined)
           + 3 * Dp * 4)               # bias / gamma / beta
    vmem_limit = _vmem_limit(est)

    kernel = functools.partial(_fused_linear_layernorm_kernel,
                               d_real=D, eps=eps, matmul_dtype=matmul_dtype)

    # Grid-invariant operands: whole array resident in VMEM (memory_space spec, no
    # block pipeline) -> exactly one copy, never double-buffered.
    resident = pl.BlockSpec(memory_space=pltpu.MemorySpace.VMEM)

    out2d = pl.pallas_call(
        kernel,
        out_shape=jax.ShapeDtypeStruct((Mp, Dp), out_dtype),
        grid_spec=pltpu.PrefetchScalarGridSpec(
            num_scalar_prefetch=0,
            grid=(grid,),
            in_specs=[
                pl.BlockSpec((tm, Hp), lambda i: (i, 0)),   # activation row tile
                resident,                                   # weight   (Hp, Dp)
                resident,                                   # bias     (1, Dp)
                resident,                                   # ln gamma (1, Dp)
                resident,                                   # ln beta  (1, Dp)
            ],
            out_specs=pl.BlockSpec((tm, Dp), lambda i: (i, 0)),
        ),
        compiler_params=pltpu.CompilerParams(
            dimension_semantics=("parallel",),
            vmem_limit_bytes=vmem_limit,
        ),
    )(x2d, w_p, b_p, g_p, beta_p)

    if Mp != M or Dp != D:
        out2d = out2d[:M, :D]
    return out2d.reshape(B, S, D)


def _reference(last_hidden_state, w, b, gamma, beta, *,
               matmul_dtype=jnp.bfloat16, eps=1e-6):
    y = jnp.einsum("bsh,hd->bsd",
                   last_hidden_state.astype(matmul_dtype),
                   w.astype(matmul_dtype),
                   preferred_element_type=jnp.float32) + b
    mean = jnp.mean(y, axis=-1, keepdims=True)
    var = jnp.mean((y - mean) ** 2, axis=-1, keepdims=True)
    out = (y - mean) * jax.lax.rsqrt(var + eps) * gamma + beta
    return out.astype(last_hidden_state.dtype)


if __name__ == "__main__":
    # Small shapes consistent with the module's forward:
    #   last_hidden_state: [batch=2, seq=8, bert_hidden=32] -> output [2, 8, d_model=32]
    B, S, H_BERT, D_MODEL = 2, 8, 32, 32

    key = jax.random.PRNGKey(0)
    k_x, k_w, k_b = jax.random.split(key, 3)

    last_hidden_state = jax.random.normal(k_x, (B, S, H_BERT), dtype=jnp.float32)

    # Deterministic parameter init (nn.Linear(bert_model, d_model), nn.LayerNorm(d_model))
    w = jax.random.normal(k_w, (H_BERT, D_MODEL), dtype=jnp.float32) * 0.05
    b = jax.random.normal(k_b, (D_MODEL,), dtype=jnp.float32) * 0.01
    gamma = jnp.ones((D_MODEL,), dtype=jnp.float32)
    beta = jnp.zeros((D_MODEL,), dtype=jnp.float32)

    out = bert_encoder1_forward(last_hidden_state, w, b, gamma, beta)
    out = jax.block_until_ready(out)

    ref_bf16 = _reference(last_hidden_state, w, b, gamma, beta,
                          matmul_dtype=jnp.bfloat16)
    ref_f32 = _reference(last_hidden_state, w, b, gamma, beta,
                         matmul_dtype=jnp.float32)

    assert out.shape == (B, S, D_MODEL)
    assert out.dtype == last_hidden_state.dtype
    assert jnp.allclose(out, ref_bf16, atol=1e-4, rtol=1e-4), "mismatch vs bf16 reference"
    # Looser check against the true-f32 Linear+LayerNorm (bf16 MXU inputs deviate slightly).
    assert jnp.allclose(out, ref_f32, atol=5e-2, rtol=5e-2), "mismatch vs f32 reference"

    print("KERNEL_OK")
</pallas_src>

<mosaic_0001>
module attributes {stable_mosaic.version = 11 : i64} {
  func.func @_fused_linear_layernorm_kernel(%arg0: i32, %arg1: memref<16x128xf32, #tpu.memory_space<vmem>>, %arg2: memref<128x128xbf16, #tpu.memory_space<vmem>>, %arg3: memref<1x128xf32, #tpu.memory_space<vmem>>, %arg4: memref<1x128xf32, #tpu.memory_space<vmem>>, %arg5: memref<1x128xf32, #tpu.memory_space<vmem>>, %arg6: memref<16x128xf32, #tpu.memory_space<vmem>>) attributes {dimension_semantics = [#tpu.dimension_semantics<parallel>], iteration_bounds = array<i64: 1>, scalar_prefetch = 0 : i64, scratch_operands = 0 : i64, tpu.core_type = #tpu.core_type<tc>, window_params = [{transform_indices = @transform_0, window_bounds = array<i64: 16, 128>}, {pipeline_mode = #tpu.pipeline_mode<synchronous>, transform_indices = @transform_1, window_bounds = array<i64: 128, 128>}, {pipeline_mode = #tpu.pipeline_mode<synchronous>, transform_indices = @transform_2, window_bounds = array<i64: 1, 128>}, {pipeline_mode = #tpu.pipeline_mode<synchronous>, transform_indices = @transform_3, window_bounds = array<i64: 1, 128>}, {pipeline_mode = #tpu.pipeline_mode<synchronous>, transform_indices = @transform_4, window_bounds = array<i64: 1, 128>}, {transform_indices = @transform_5, window_bounds = array<i64: 16, 128>}]} {
    %c0 = arith.constant 0 : index
    %c0_0 = arith.constant 0 : index
    %0 = vector.load %arg1[%c0, %c0_0] : memref<16x128xf32, #tpu.memory_space<vmem>>, vector<16x128xf32>
    %1 = arith.truncf %0 : vector<16x128xf32> to vector<16x128xbf16>
    %c0_1 = arith.constant 0 : index
    %c0_2 = arith.constant 0 : index
    %2 = vector.load %arg2[%c0_1, %c0_2] : memref<128x128xbf16, #tpu.memory_space<vmem>>, vector<128x128xbf16>
    %cst = arith.constant dense<0.000000e+00> : vector<16x128xf32>
    %3 = tpu.matmul %1, %2, %cst {dimension_numbers = #tpu.dot_dimension_numbers<[1], [0], [0], [1], [0, 0, 1, 1], [], []>} : vector<16x128xbf16>, vector<128x128xbf16>, vector<16x128xf32> -> vector<16x128xf32>
    %c0_3 = arith.constant 0 : index
    %c0_4 = arith.constant 0 : index
    %4 = vector.load %arg3[%c0_3, %c0_4] : memref<1x128xf32, #tpu.memory_space<vmem>>, vector<1x128xf32>
    %5 = vector.broadcast %4 : vector<1x128xf32> to vector<16x128xf32>
    %6 = arith.addf %3, %5 : vector<16x128xf32>
    %cst_5 = arith.constant dense<0.000000e+00> : vector<16xf32>
    %7 = vector.multi_reduction <add>, %6, %cst_5 [1] : vector<16x128xf32> to vector<16xf32>
    %8 = vector.shape_cast %7 : vector<16xf32> to vector<16x1xf32>
    %9 = arith.mulf %6, %6 : vector<16x128xf32>
    %cst_6 = arith.constant dense<0.000000e+00> : vector<16xf32>
    %10 = vector.multi_reduction <add>, %9, %cst_6 [1] : vector<16x128xf32> to vector<16xf32>
    %11 = vector.shape_cast %10 : vector<16xf32> to vector<16x1xf32>
    %cst_7 = arith.constant 3.125000e-02 : f32
    %12 = vector.broadcast %cst_7 : f32 to vector<16x1xf32>
    %13 = arith.mulf %8, %12 : vector<16x1xf32>
    %cst_8 = arith.constant 3.125000e-02 : f32
    %14 = vector.broadcast %cst_8 : f32 to vector<16x1xf32>
    %15 = arith.mulf %11, %14 : vector<16x1xf32>
    %16 = arith.mulf %13, %13 : vector<16x1xf32>
    %17 = arith.subf %15, %16 : vector<16x1xf32>
    %cst_9 = arith.constant 9.99999997E-7 : f32
    %18 = vector.broadcast %cst_9 : f32 to vector<16x1xf32>
    %19 = arith.addf %17, %18 : vector<16x1xf32>
    %20 = math.rsqrt %19 : vector<16x1xf32>
    %21 = arith.mulf %13, %20 : vector<16x1xf32>
    %22 = vector.broadcast %20 : vector<16x1xf32> to vector<16x128xf32>
    %23 = arith.mulf %6, %22 : vector<16x128xf32>
    %24 = vector.broadcast %21 : vector<16x1xf32> to vector<16x128xf32>
    %25 = arith.subf %23, %24 : vector<16x128xf32>
    %c0_10 = arith.constant 0 : index
    %c0_11 = arith.constant 0 : index
    %26 = vector.load %arg4[%c0_10, %c0_11] : memref<1x128xf32, #tpu.memory_space<vmem>>, vector<1x128xf32>
    %27 = vector.broadcast %26 : vector<1x128xf32> to vector<16x128xf32>
    %28 = arith.mulf %25, %27 : vector<16x128xf32>
    %c0_12 = arith.constant 0 : index
    %c0_13 = arith.constant 0 : index
    %29 = vector.load %arg5[%c0_12, %c0_13] : memref<1x128xf32, #tpu.memory_space<vmem>>, vector<1x128xf32>
    %30 = vector.broadcast %29 : vector<1x128xf32> to vector<16x128xf32>
    %31 = arith.addf %28, %30 : vector<16x128xf32>
    %c0_14 = arith.constant 0 : index
    %c0_15 = arith.constant 0 : index
    %32 = vector.load %arg6[%c0_14, %c0_15] : memref<16x128xf32, #tpu.memory_space<vmem>>, vector<16x128xf32>
    tpu.vector_store %arg6[%c0_14, %c0_15], %31 {strides = array<i32>} : memref<16x128xf32, #tpu.memory_space<vmem>>, vector<16x128xf32>,
    return
  }
  func.func @transform_0(%arg0: i32) -> (i32, i32) {
    %c0_i32 = arith.constant 0 : i32
    %c0_i32_0 = arith.constant 0 : i32
    return %arg0, %c0_i32 : i32, i32
  }
  func.func @transform_1(%arg0: i32) -> (i32, i32) {
    %c0_i32 = arith.constant 0 : i32
    %c0_i32_0 = arith.constant 0 : i32
    %c0_i32_1 = arith.constant 0 : i32
    return %c0_i32, %c0_i32_0 : i32, i32
  }
  func.func @transform_2(%arg0: i32) -> (i32, i32) {
    %c0_i32 = arith.constant 0 : i32
    %c0_i32_0 = arith.constant 0 : i32
    %c0_i32_1 = arith.constant 0 : i32
    return %c0_i32, %c0_i32_0 : i32, i32
  }
  func.func @transform_3(%arg0: i32) -> (i32, i32) {
    %c0_i32 = arith.constant 0 : i32
    %c0_i32_0 = arith.constant 0 : i32
    %c0_i32_1 = arith.constant 0 : i32
    return %c0_i32, %c0_i32_0 : i32, i32
  }
  func.func @transform_4(%arg0: i32) -> (i32, i32) {
    %c0_i32 = arith.constant 0 : i32
    %c0_i32_0 = arith.constant 0 : i32
    %c0_i32_1 = arith.constant 0 : i32
    return %c0_i32, %c0_i32_0 : i32, i32
  }
  func.func @transform_5(%arg0: i32) -> (i32, i32) {
    %c0_i32 = arith.constant 0 : i32
    %c0_i32_0 = arith.constant 0 : i32
    return %arg0, %c0_i32 : i32, i32
  }
}

</mosaic_0001>

<bundles_post_ra>
// kernel: tpu_custom_call.1
= control target key start
LH: loop header
LB: loop body
LE: loop exit
PB: predicated region body
PF: predicated region fallthrough
CT: control target
= control target key end

     0   :  { %10 = vsyncpa [#allocation3], 0  ;;  %s454_s0 = inlined_call_operand.hbm [shape: f32[16,128], index: 0, kind: input, shape index: {}]   ;;  %s455_s1 = inlined_call_operand.hbm [shape: bf16[128,128], index: 1, kind: input, shape index: {}]   ;;  %s456_s2 = inlined_call_operand.vmem [shape: f32[1,128], index: 2, kind: input, shape index: {}]   ;;  %s457_s3 = inlined_call_operand.vmem [shape: f32[1,128], index: 3, kind: input, shape index: {}]   ;;  %s458_s4 = inlined_call_operand.vmem [shape: f32[1,128], index: 4, kind: input, shape index: {}]   ;;  %s459_s5 = inlined_call_operand.hbm [shape: f32[16,128], index: 5, kind: output, shape index: {}]  }
   0x1   :  { %11 = vsyncpa [#allocation6], 0 }
   0x2   :  { %12 = vsyncpa [#allocation4], 0  ;;  %s364_s18 = smov [#allocation2]   ;;  %s292_s22 = scalar_lea.hbm %s454_s0, 256 }
   0x3   :  { %s18_s19 = sshll.u32 %s364_s18, 4  ;;  %p293_p0 = scmp.ne.s32.totalorder %s454_s0, %s292_s22  ;;  %s19_s19 = int_to_ptr.vmem [resolvable:$true] %s18_s19 }
   0x4   :  { %p296_p1 = scmp.lt.u32.totalorder %s292_s22, %s454_s0 }
   0x6   :  { %p298_p2 = pnand %p296_p1, %p293_p0 }
   0x8   :  { %301 = shalt.err (!%p298_p2)
}
   0x9   :  { %s302_s27 = scalar_lea.vmem %s19_s19, 256  ;;  %p307_p4 = scmp.lt.s32.totalorder %s19_s19, %s19_s19 }
   0xa   :  { %p303_p3 = scmp.ne.s32.totalorder %s19_s19, %s302_s27  ;;  %p308_p5 = scmp.lt.s32.totalorder %s302_s27, %s302_s27 }
   0xc   :  { %p309_p6 = por %p308_p5, %p307_p4 }
   0xe   :  { %p310_p7 = pnand %p309_p6, %p303_p3 }
  0x10   :  { %313 = shalt.err (!%p310_p7)
}
  0x11   :  { %s365_s28 = smov 128   ;;  %s366_s29 = smov 8  }
  0x12   :  { %24 = dma.hbm_to_vmem [thread:$0]  %s454_s0, 256, %s19_s19, [#allocation3], %s365_s28, %s365_s28, %s366_s29  }
  0x13   :  { %s367_s7 = smov [#allocation5]   ;;  %s314_s11 = scalar_lea.hbm %s455_s1, 1024 }
  0x14   :  { %s30_s8 = sshll.u32 %s367_s7, 4  ;;  %p315_p8 = scmp.ne.s32.totalorder %s455_s1, %s314_s11  ;;  %s31_s8 = int_to_ptr.vmem [resolvable:$true] %s30_s8 }
  0x15   :  { %p318_p9 = scmp.lt.u32.totalorder %s314_s11, %s455_s1 }
  0x17   :  { %p320_p10 = pnand %p318_p9, %p315_p8 }
  0x19   :  { %323 = shalt.err (!%p320_p10)
}
  0x1a   :  { %s324_s16 = scalar_lea.vmem %s31_s8, 1024  ;;  %p329_p12 = scmp.lt.s32.totalorder %s31_s8, %s31_s8 }
  0x1b   :  { %p325_p11 = scmp.ne.s32.totalorder %s31_s8, %s324_s16  ;;  %p330_p13 = scmp.lt.s32.totalorder %s324_s16, %s324_s16 }
  0x1d   :  { %p331_p0 = por %p330_p13, %p329_p12 }
  0x1f   :  { %p332_p1 = pnand %p331_p0, %p325_p11 }
  0x21   :  { %335 = shalt.err (!%p332_p1)
}
  0x22   :  { %s368_s0 = smov 64   ;;  %s369_s17 = smov 4  }
  0x23   :  { %36 = dma.hbm_to_vmem [thread:$0]  %s455_s1, 1024, %s31_s8, [#allocation6], %s368_s0, %s368_s0, %s369_s17  }
  0x24   :  { %358 = dma.done.wait [#allocation3], 256  }
  0x25   :  { %359 = vsyncadd [#allocation3], 4294967040 }
  0x26   :  { %360 = dma.done.wait [#allocation6], 1024  }
  0x27   :  { %361 = vsyncadd [#allocation6], 4294966272  ;;  %v370_v0 = vmov 0.0   ;;  %vm371_vm0 = vmmov 0   ;;  %v280_v1 = vld [vmem:[#allocation5] sm:$0xff]   ;;  %v281_v2 = vld [vmem:[#allocation5 + $0x8] sm:$0xff]  }
  0x28   :  { %251 = vmatprep.subr.bf16.mxu0 %v370_v0  ;;  %267 = vmatprep.mubr.msk.bf16.mxu0 %vm371_vm0, %v370_v0  ;;  %v282_v3 = vld [vmem:[#allocation5 + $0x10] sm:$0xff]   ;;  %v283_v4 = vld [vmem:[#allocation5 + $0x18] sm:$0xff]   ;;  %v284_v5 = vld [vmem:[#allocation5 + $0x20] sm:$0xff]   ;;  %s372_s24 = smov [#allocation7]  }
  0x29   :  { %252 = vmatpush3.bf16.msra.mxu0 %v280_v1  ;;  %v285_v6 = vld [vmem:[#allocation5 + $0x28] sm:$0xff]   ;;  %v286_v7 = vld [vmem:[#allocation5 + $0x30] sm:$0xff]   ;;  %v287_v8 = vld [vmem:[#allocation5 + $0x38] sm:$0xff]   ;;  %s218_s25 = sshll.u32 %s372_s24, 4  ;;  %s219_s25 = int_to_ptr.vmem [resolvable:$true] %s218_s25 }
  0x2a   :  { %253 = vmatprep.subr.bf16.mxu0 %v370_v0  ;;  %v50_v9 = vld [vmem:[#allocation2] sm:$0xff]  ;;  %v51_v10 = vld [vmem:[#allocation2 + $0x8] sm:$0xff]  ;;  %s336_s26 = scalar_lea.vmem %s219_s25, 256  ;;  %p341_p3 = scmp.lt.s32.totalorder %s219_s25, %s219_s25 }
  0x2b   :  { %v52_v11 = vpack.c.bf16 %v51_v10, %v50_v9  ;;  %v231_v12 = vld [vmem:[%s456_s2] ss:$0 sm:$0xff]  ;;  %p337_p2 = scmp.ne.s32.totalorder %s219_s25, %s336_s26  ;;  %p342_p4 = scmp.lt.s32.totalorder %s336_s26, %s336_s26 }
  0x2c   :  { %v240_v38 = vld [vmem:[%s457_s3] ss:$0 sm:$0xff] }
  0x2d   :  { %254 = vmatpush3.bf16.msra.mxu0 %v281_v2  ;;  %v241_v41 = vld [vmem:[%s458_s4] ss:$0 sm:$0xff]  ;;  %p343_p5 = por %p342_p4, %p341_p3 }
  0x2e   :  { %255 = vmatprep.subr.bf16.mxu0 %v370_v0 }
  0x2f   :  { %p344_p6 = pnand %p343_p5, %p337_p2 }
  0x31   :  { %256 = vmatpush3.bf16.msra.mxu0 %v282_v3 }
  0x32   :  { %257 = vmatprep.subr.bf16.mxu0 %v370_v0 }
  0x35   :  { %258 = vmatpush3.bf16.msra.mxu0 %v283_v4 }
  0x36   :  { %259 = vmatprep.subr.bf16.mxu0 %v370_v0 }
  0x39   :  { %260 = vmatpush3.bf16.msra.mxu0 %v284_v5 }
  0x3a   :  { %261 = vmatprep.subr.bf16.mxu0 %v370_v0 }
  0x3d   :  { %262 = vmatpush3.bf16.msra.mxu0 %v285_v6 }
  0x3e   :  { %263 = vmatprep.subr.bf16.mxu0 %v370_v0 }
  0x41   :  { %264 = vmatpush3.bf16.msra.mxu0 %v286_v7 }
  0x42   :  { %265 = vmatprep.subr.bf16.mxu0 %v370_v0 }
  0x45   :  { %266 = vmatpush3.bf16.msra.mxu0 %v287_v8 }
  0x48   :  { %268 = vmatmul.mubr.bf16.vlgmr.msra.gmra.mrb[0].mxu0 %v52_v11 }
 0x11b   :  { %v158_v13 = vpop.f32.mrb[0].mxu0 }
 0x11c   :  { %v159_v14 = vadd.f32 %v231_v12, %v158_v13  ;;  %v269_v15 = vpop.f32.mrb[1].mxu0 }
 0x11d   :  { %v161_v16 = vpop.f32.mrb[2].mxu0 }
 0x11e   :  { %v162_v17 = vadd.f32 %v231_v12, %v161_v16  ;;  %165 = vadd.xlane.f32.xlu0 %v159_v14  ;;  %v270_v18 = vpop.f32.mrb[3].mxu0  ;;  %v169_v19 = vmul.f32 %v159_v14, %v159_v14 }
 0x120   :  { %171 = vadd.xlane.f32.xlu1 %v169_v19  ;;  %v170_v20 = vmul.f32 %v162_v17, %v162_v17 }
 0x122   :  { %167 = vadd.xlane.f32.xlu0 %v162_v17 }
 0x124   :  { %173 = vadd.xlane.f32.xlu1 %v170_v20 }
 0x1ab   :  { %v166_v21 = vpop.xlane.xlu0 %165 }
 0x1ac   :  { %v175_v22 = vmul.f32 0.03125, %v166_v21 }
 0x1ad   :  { %v172_v23 = vpop.xlane.xlu1 %171 }
 0x1ae   :  { %v179_v24 = vmul.f32 %v175_v22, %v175_v22  ;;  %v177_v25 = vmul.f32 0.03125, %v172_v23 }
 0x1af   :  { %v168_v26 = vpop.xlane.xlu0 %167 }
 0x1b0   :  { %v181_v27 = vsub.f32 %v177_v25, %v179_v24  ;;  %v176_v28 = vmul.f32 0.03125, %v168_v26 }
 0x1b1   :  { %v174_v29 = vpop.xlane.xlu1 %173 }
 0x1b2   :  { %v183_v30 = vadd.f32 1e-06, %v181_v27  ;;  %v180_v31 = vmul.f32 %v176_v28, %v176_v28  ;;  %v178_v32 = vmul.f32 0.03125, %v174_v29 }
 0x1b4   :  { %288 = vrsqrt.f32 %v183_v30  ;;  %v182_v33 = vsub.f32 %v178_v32, %v180_v31 }
 0x1b6   :  { %v184_v34 = vadd.f32 1e-06, %v182_v33 }
 0x1b8   :  { %290 = vrsqrt.f32 %v184_v34 }
 0x1be   :  { %v289_v35 = vpop.eup %288 }
 0x1bf   :  { %v187_v36 = vmul.f32 %v289_v35, %v175_v22  ;;  %v189_v37 = vmul.f32 %v289_v35, %v159_v14 }
 0x1c1   :  { %v191_v39 = vsub.f32 %v189_v37, %v187_v36 }
 0x1c2   :  { %v291_v40 = vpop.eup %290 }
 0x1c3   :  { %v188_v42 = vmul.f32 %v291_v40, %v176_v28  ;;  %v190_v43 = vmul.f32 %v291_v40, %v162_v17  ;;  %v200_v44 = vmul.f32 %v240_v38, %v191_v39 }
 0x1c5   :  { %v192_v45 = vsub.f32 %v190_v43, %v188_v42  ;;  %v209_v46 = vadd.f32 %v241_v41, %v200_v44 }
 0x1c7   :  { %v201_v47 = vmul.f32 %v240_v38, %v192_v45  ;;  %211 = vst [vmem:[#allocation7] sm:$0xff] %v209_v46 }
 0x1c9   :  { %v210_v48 = vadd.f32 %v241_v41, %v201_v47 }
 0x1cb   :  { %212 = vst [vmem:[#allocation7 + $0x8] sm:$0xff] %v210_v48 }
 0x1cc   :  { %347 = shalt.err (!%p344_p6)
}
 0x1cd   :  { %s348_s27 = scalar_lea.hbm %s459_s5, 256 }
 0x1ce   :  { %p349_p7 = scmp.ne.s32.totalorder %s459_s5, %s348_s27  ;;  %p352_p8 = scmp.lt.u32.totalorder %s348_s27, %s459_s5 }
 0x1d0   :  { %p354_p9 = pnand %p352_p8, %p349_p7 }
 0x1d2   :  { %357 = shalt.err (!%p354_p9)
}
 0x1d3   :  { %224 = dma.vmem_to_hbm [thread:$0]  %s219_s25, 256, %s459_s5, [#allocation4], %s365_s28, %s365_s28, %s366_s29  }
 0x1d4   :  { %362 = dma.done.wait [#allocation4], 256  }
 0x1d5   :  { %363 = vsyncadd [#allocation4], 4294967040 }
 0x1d6   :  { %228 = vsyncpa [#allocation3], 1 }
 0x1d7   :  { %229 = vsyncpa [#allocation6], 1 }
 0x1d8   :  { %230 = vsyncpa [#allocation4], 1 }

</bundles_post_ra>
